<compile_context>
chip_gen: v7x
topology: tpu7x:2x2x1
jax: 0.10.0
libtpu: 0.0.40
codegen_flags: <defaults>
</compile_context>

<pallas_src>
import math
import jax
import jax.numpy as jnp
from jax.experimental import pallas as pl
from jax.experimental.pallas import tpu as pltpu

# Small, module-consistent shapes
B, S, D, H, DFF = 2, 8, 32, 4, 64
DK = D // H
EPS = 1e-6
NEG_INF = -1e9


# ---------------- kernel-side helpers ---------------------------------------
def _layer_norm_k(x, gamma, beta):
    # Annotated Transformer LayerNorm: a_2 * (x - mean) / (std + eps) + b_2
    # (unbiased std, as torch.Tensor.std default).  Exact divide: the EUP/VPU
    # have huge slack at this size and LN error feeds both residual streams.
    mean = jnp.mean(x, axis=-1, keepdims=True)
    var = jnp.sum((x - mean) ** 2, axis=-1, keepdims=True) * (1.0 / (x.shape[-1] - 1))
    return gamma * (x - mean) / (jnp.sqrt(var) + EPS) + beta


def _softmax_last_k(s):
    # Approximate reciprocal only here (EUP slot, ~free); error is tiny since
    # it only rescales probabilities that sum to ~1.
    m = jnp.max(s, axis=-1, keepdims=True)
    e = jnp.exp(s - m)
    return e * pl.reciprocal(jnp.sum(e, axis=-1, keepdims=True), approx=True)


# ---------------------------------- kernel ----------------------------------
def encoder_layer_kernel(x_ref, mask_ref, wslab_ref, w1_ref, w2_ref, b1_ref,
                         vec_ref, o_ref):
    # One batch element per grid step.
    x = x_ref[...]        # (S, D) f32 tokens
    mask = mask_ref[...]  # (1, 1, S) 1=keep, 0=mask

    # Unpack the packed parameter slabs (static slices / leading-axis indices:
    # contiguous loads, no lane-offset relayouts).
    wq = wslab_ref[0]     # (D, D) bf16
    wk = wslab_ref[1]
    wv = wslab_ref[2]
    wo = wslab_ref[3]
    bq = vec_ref[0:1, :]  # (1, D) f32
    bk = vec_ref[1:2, :]
    bv = vec_ref[2:3, :]
    bo = vec_ref[3:4, :]
    g1 = vec_ref[4:5, :]
    be1 = vec_ref[5:6, :]
    g2 = vec_ref[6:7, :]
    be2 = vec_ref[7:8, :]
    b2 = vec_ref[8:9, :]

    # Additive mask: 0 where keep, -1e9 where masked; broadcasts over (H, S, S).
    neg = jnp.where(mask == 0.0, NEG_INF, 0.0)                        # (1, 1, S)

    # ---- Sublayer 0: pre-LayerNorm + multi-head self-attention ----
    xn = _layer_norm_k(x, g1, be1)                                    # (S, D) f32
    xnb = xn.astype(jnp.bfloat16)
    q = jnp.dot(xnb, wq, preferred_element_type=jnp.float32) + bq     # (S, D) f32
    k = jnp.dot(xnb, wk, preferred_element_type=jnp.float32) + bk
    v = jnp.dot(xnb, wv, preferred_element_type=jnp.float32) + bv

    # Head split: one reshape + one transpose (no Python-unrolled stacks).
    qh = jnp.transpose(q.reshape(S, H, DK), (1, 0, 2)).astype(jnp.bfloat16)  # (H, S, DK)
    kh = jnp.transpose(k.reshape(S, H, DK), (1, 0, 2)).astype(jnp.bfloat16)
    vh = jnp.transpose(v.reshape(S, H, DK), (1, 0, 2)).astype(jnp.bfloat16)

    scale = 1.0 / math.sqrt(DK)
    # Head-batched QK^T with the transpose folded into the contraction.
    s = jnp.einsum('hqd,hkd->hqk', qh, kh,
                   preferred_element_type=jnp.float32) * scale + neg  # (H, S, S) f32
    p = _softmax_last_k(s)
    ctx = jnp.einsum('hqk,hkd->hqd', p.astype(jnp.bfloat16), vh,
                     preferred_element_type=jnp.float32)              # (H, S, DK) f32

    # Head merge: one transpose + one reshape.
    attn = jnp.transpose(ctx, (1, 0, 2)).reshape(S, D)                # (S, D)

    attn_out = jnp.dot(attn.astype(jnp.bfloat16), wo,
                       preferred_element_type=jnp.float32) + bo
    # TODO(synk): dropout treated as identity (eval mode); training-mode RNG dropout not emitted.
    x1 = x + attn_out

    # ---- Sublayer 1: pre-LayerNorm + position-wise feed-forward ----
    xn2 = _layer_norm_k(x1, g2, be2)
    h1 = jnp.maximum(
        jnp.dot(xn2.astype(jnp.bfloat16), w1_ref[...],
                preferred_element_type=jnp.float32) + b1_ref[...], 0.0)
    ff = jnp.dot(h1.astype(jnp.bfloat16), w2_ref[...],
                 preferred_element_type=jnp.float32) + b2
    o_ref[...] = x1 + ff


# --------------------------------- wrapper ----------------------------------
def encoder_layer(x, mask, params):
    (wq, bq, wk, bk, wv, bv, wo, bo, w1, b1, w2, b2, g1, be1, g2, be2) = params

    # Host-side packing: fewer HBM->VMEM DMAs.
    #   * 4 projection weights -> one (4, D, D) bf16 slab (leading-axis indexed
    #     inside the kernel, so no lane-offset slicing).
    #   * 9 (1, D) vectors (biases + LN gamma/beta) -> one (9, D) f32 slab.
    wslab = jnp.stack([wq, wk, wv, wo], axis=0).astype(jnp.bfloat16)   # (4, D, D)
    vecs = jnp.concatenate([bq, bk, bv, bo, g1, be1, g2, be2, b2], axis=0)  # (9, D)
    w1b = w1.astype(jnp.bfloat16)                                      # (D, DFF)
    w2b = w2.astype(jnp.bfloat16)                                      # (DFF, D)

    # Token slab flattened to (B*S, D); the batch grid picks one (S, D) block
    # per step.  Weight/param blocks use constant index maps (fetched once,
    # stay resident).
    x_flat = x.reshape(B * S, D)

    out_flat = pl.pallas_call(
        encoder_layer_kernel,
        out_shape=jax.ShapeDtypeStruct((B * S, D), jnp.float32),
        grid=(B,),
        in_specs=[
            pl.BlockSpec((S, D), lambda b: (b, 0)),        # x tokens of batch b
            pl.BlockSpec((1, 1, S), lambda b: (b, 0, 0)),  # mask of batch b
            pl.BlockSpec((4, D, D), lambda b: (0, 0, 0)),  # packed Wq/Wk/Wv/Wo
            pl.BlockSpec((D, DFF), lambda b: (0, 0)),      # FFN W1
            pl.BlockSpec((DFF, D), lambda b: (0, 0)),      # FFN W2
            pl.BlockSpec((1, DFF), lambda b: (0, 0)),      # FFN b1
            pl.BlockSpec((9, D), lambda b: (0, 0)),        # packed biases + LN params
        ],
        out_specs=pl.BlockSpec((S, D), lambda b: (b, 0)),
        compiler_params=pltpu.CompilerParams(
            # Batch axis is embarrassingly parallel -> both v7x TensorCores;
            # harmless no-op on single-core v5e/v6e.
            dimension_semantics=("parallel",),
            # Explicit VMEM budget (>= default scoped limit on v5e's 16 MiB,
            # within v7x's 64 MiB physical); everything here is a few KB.
            vmem_limit_bytes=32 * 1024 * 1024,
        ),
    )(x_flat, mask, wslab, w1b, w2b, b1, vecs)
    return out_flat.reshape(B, S, D)


# -------------------------- pure-JAX reference (exact f32) ------------------
def _layer_norm_ref(x, gamma, beta):
    mean = jnp.mean(x, axis=-1, keepdims=True)
    var = jnp.sum((x - mean) ** 2, axis=-1, keepdims=True) / (x.shape[-1] - 1)
    return gamma * (x - mean) / (jnp.sqrt(var) + EPS) + beta


def _reference(x, mask, params):
    (wq, bq, wk, bk, wv, bv, wo, bo, w1, b1, w2, b2, g1, be1, g2, be2) = params
    out = []
    for b in range(B):
        xb = x[b]
        mb = mask[b]
        xn = _layer_norm_ref(xb, g1, be1)
        q = xn @ wq + bq
        k = xn @ wk + bk
        v = xn @ wv + bv
        heads = []
        for h in range(H):
            qh, kh, vh = (t[:, h * DK:(h + 1) * DK] for t in (q, k, v))
            s = (qh @ kh.T) / math.sqrt(DK)
            s = jnp.where(mb == 0.0, NEG_INF, s)
            heads.append(jax.nn.softmax(s, axis=-1) @ vh)
        x1 = xb + (jnp.concatenate(heads, axis=-1) @ wo + bo)
        xn2 = _layer_norm_ref(x1, g2, be2)
        ff = jnp.maximum(xn2 @ w1 + b1, 0.0) @ w2 + b2
        out.append(x1 + ff)
    return jnp.stack(out)


if __name__ == "__main__":
    key = jax.random.PRNGKey(0)
    keys = jax.random.split(key, 16)

    x = jax.random.normal(keys[0], (B, S, D), dtype=jnp.float32)
    # mask: all positions valid except the last two keys of batch 1
    mask = jnp.ones((B, 1, S), dtype=jnp.float32)
    mask = mask.at[1, 0, -2:].set(0.0)

    def w(k, shape, scale=0.1):
        return scale * jax.random.normal(k, shape, dtype=jnp.float32)

    params = (
        w(keys[1], (D, D)),    w(keys[2], (1, D)),     # Wq, bq
        w(keys[3], (D, D)),    w(keys[4], (1, D)),     # Wk, bk
        w(keys[5], (D, D)),    w(keys[6], (1, D)),     # Wv, bv
        w(keys[7], (D, D)),    w(keys[8], (1, D)),     # Wo, bo
        w(keys[9], (D, DFF)),  w(keys[10], (1, DFF)),  # FFN W1, b1
        w(keys[11], (DFF, D)), w(keys[12], (1, D)),    # FFN W2, b2
        jnp.ones((1, D), jnp.float32), jnp.zeros((1, D), jnp.float32),  # LN1 a_2, b_2
        jnp.ones((1, D), jnp.float32), jnp.zeros((1, D), jnp.float32),  # LN2 a_2, b_2
    )

    out = jax.block_until_ready(encoder_layer(x, mask, params))
    ref = jax.block_until_ready(_reference(x, mask, params))
    assert out.shape == (B, S, D)
    # Tolerance reflects bf16 MXU operands (f32 accumulation) vs. the exact
    # f32 reference; LayerNorm now uses an exact divide, approx reciprocal is
    # confined to the softmax denominator.
    assert jnp.allclose(out, ref, atol=2e-2, rtol=2e-2), float(jnp.max(jnp.abs(out - ref)))
    print("KERNEL_OK")
</pallas_src>

<mosaic_0001>
module attributes {stable_mosaic.version = 11 : i64} {
  func.func @encoder_layer_kernel(%arg0: i32, %arg1: memref<8x32xf32, #tpu.memory_space<vmem>>, %arg2: memref<1x1x8xf32, #tpu.memory_space<vmem>>, %arg3: memref<4x32x32xbf16, #tpu.memory_space<vmem>>, %arg4: memref<32x64xbf16, #tpu.memory_space<vmem>>, %arg5: memref<64x32xbf16, #tpu.memory_space<vmem>>, %arg6: memref<1x64xf32, #tpu.memory_space<vmem>>, %arg7: memref<9x32xf32, #tpu.memory_space<vmem>>, %arg8: memref<8x32xf32, #tpu.memory_space<vmem>>) attributes {dimension_semantics = [#tpu.dimension_semantics<parallel>], iteration_bounds = array<i64: 2>, scalar_prefetch = 0 : i64, scratch_operands = 0 : i64, tpu.core_type = #tpu.core_type<tc>, window_params = [{transform_indices = @transform_0, window_bounds = array<i64: 8, 32>}, {transform_indices = @transform_1, window_bounds = array<i64: 1, 1, 8>}, {pipeline_mode = #tpu.pipeline_mode<synchronous>, transform_indices = @transform_2, window_bounds = array<i64: 4, 32, 32>}, {pipeline_mode = #tpu.pipeline_mode<synchronous>, transform_indices = @transform_3, window_bounds = array<i64: 32, 64>}, {pipeline_mode = #tpu.pipeline_mode<synchronous>, transform_indices = @transform_4, window_bounds = array<i64: 64, 32>}, {pipeline_mode = #tpu.pipeline_mode<synchronous>, transform_indices = @transform_5, window_bounds = array<i64: 1, 64>}, {pipeline_mode = #tpu.pipeline_mode<synchronous>, transform_indices = @transform_6, window_bounds = array<i64: 9, 32>}, {transform_indices = @transform_7, window_bounds = array<i64: 8, 32>}]} {
    %c0 = arith.constant 0 : index
    %c0_0 = arith.constant 0 : index
    %0 = vector.load %arg1[%c0, %c0_0] : memref<8x32xf32, #tpu.memory_space<vmem>>, vector<8x32xf32>
    %c0_1 = arith.constant 0 : index
    %c0_2 = arith.constant 0 : index
    %c0_3 = arith.constant 0 : index
    %1 = vector.load %arg2[%c0_1, %c0_2, %c0_3] : memref<1x1x8xf32, #tpu.memory_space<vmem>>, vector<1x1x8xf32>
    %c0_4 = arith.constant 0 : index
    %c0_5 = arith.constant 0 : index
    %c0_6 = arith.constant 0 : index
    %2 = vector.load %arg3[%c0_4, %c0_5, %c0_6] : memref<4x32x32xbf16, #tpu.memory_space<vmem>>, vector<1x32x32xbf16>
    %3 = vector.shape_cast %2 : vector<1x32x32xbf16> to vector<32x32xbf16>
    %c1 = arith.constant 1 : index
    %c0_7 = arith.constant 0 : index
    %c0_8 = arith.constant 0 : index
    %4 = vector.load %arg3[%c1, %c0_7, %c0_8] : memref<4x32x32xbf16, #tpu.memory_space<vmem>>, vector<1x32x32xbf16>
    %5 = vector.shape_cast %4 : vector<1x32x32xbf16> to vector<32x32xbf16>
    %c2 = arith.constant 2 : index
    %c0_9 = arith.constant 0 : index
    %c0_10 = arith.constant 0 : index
    %6 = vector.load %arg3[%c2, %c0_9, %c0_10] : memref<4x32x32xbf16, #tpu.memory_space<vmem>>, vector<1x32x32xbf16>
    %7 = vector.shape_cast %6 : vector<1x32x32xbf16> to vector<32x32xbf16>
    %c3 = arith.constant 3 : index
    %c0_11 = arith.constant 0 : index
    %c0_12 = arith.constant 0 : index
    %8 = vector.load %arg3[%c3, %c0_11, %c0_12] : memref<4x32x32xbf16, #tpu.memory_space<vmem>>, vector<1x32x32xbf16>
    %9 = vector.shape_cast %8 : vector<1x32x32xbf16> to vector<32x32xbf16>
    %c0_13 = arith.constant 0 : index
    %c0_14 = arith.constant 0 : index
    %10 = vector.load %arg7[%c0_13, %c0_14] : memref<9x32xf32, #tpu.memory_space<vmem>>, vector<1x32xf32>
    %c1_15 = arith.constant 1 : index
    %c0_16 = arith.constant 0 : index
    %11 = vector.load %arg7[%c1_15, %c0_16] : memref<9x32xf32, #tpu.memory_space<vmem>>, vector<1x32xf32>
    %c2_17 = arith.constant 2 : index
    %c0_18 = arith.constant 0 : index
    %12 = vector.load %arg7[%c2_17, %c0_18] : memref<9x32xf32, #tpu.memory_space<vmem>>, vector<1x32xf32>
    %c3_19 = arith.constant 3 : index
    %c0_20 = arith.constant 0 : index
    %13 = vector.load %arg7[%c3_19, %c0_20] : memref<9x32xf32, #tpu.memory_space<vmem>>, vector<1x32xf32>
    %c4 = arith.constant 4 : index
    %c0_21 = arith.constant 0 : index
    %14 = vector.load %arg7[%c4, %c0_21] : memref<9x32xf32, #tpu.memory_space<vmem>>, vector<1x32xf32>
    %c5 = arith.constant 5 : index
    %c0_22 = arith.constant 0 : index
    %15 = vector.load %arg7[%c5, %c0_22] : memref<9x32xf32, #tpu.memory_space<vmem>>, vector<1x32xf32>
    %c6 = arith.constant 6 : index
    %c0_23 = arith.constant 0 : index
    %16 = vector.load %arg7[%c6, %c0_23] : memref<9x32xf32, #tpu.memory_space<vmem>>, vector<1x32xf32>
    %c7 = arith.constant 7 : index
    %c0_24 = arith.constant 0 : index
    %17 = vector.load %arg7[%c7, %c0_24] : memref<9x32xf32, #tpu.memory_space<vmem>>, vector<1x32xf32>
    %c8 = arith.constant 8 : index
    %c0_25 = arith.constant 0 : index
    %18 = vector.load %arg7[%c8, %c0_25] : memref<9x32xf32, #tpu.memory_space<vmem>>, vector<1x32xf32>
    %cst = arith.constant 0.000000e+00 : f32
    %19 = vector.broadcast %cst : f32 to vector<1x1x8xf32>
    %20 = arith.cmpf oeq, %1, %19 : vector<1x1x8xf32>
    %cst_26 = arith.constant -1.000000e+09 : f32
    %cst_27 = arith.constant 0.000000e+00 : f32
    %21 = vector.broadcast %cst_26 : f32 to vector<1x1x8xf32>
    %22 = vector.broadcast %cst_27 : f32 to vector<1x1x8xf32>
    %23 = arith.select %20, %21, %22 : vector<1x1x8xi1>, vector<1x1x8xf32>
    %cst_28 = arith.constant dense<0.000000e+00> : vector<8xf32>
    %24 = vector.multi_reduction <add>, %0, %cst_28 [1] : vector<8x32xf32> to vector<8xf32>
    %25 = vector.shape_cast %24 : vector<8xf32> to vector<8x1xf32>
    %cst_29 = arith.constant 3.200000e+01 : f32
    %26 = vector.broadcast %cst_29 : f32 to vector<8x1xf32>
    %27 = arith.divf %25, %26 : vector<8x1xf32>
    %28 = vector.broadcast %27 : vector<8x1xf32> to vector<8x32xf32>
    %29 = arith.subf %0, %28 : vector<8x32xf32>
    %30 = arith.mulf %29, %29 : vector<8x32xf32>
    %cst_30 = arith.constant dense<0.000000e+00> : vector<8xf32>
    %31 = vector.multi_reduction <add>, %30, %cst_30 [1] : vector<8x32xf32> to vector<8xf32>
    %32 = vector.shape_cast %31 : vector<8xf32> to vector<8x1xf32>
    %cst_31 = arith.constant 0.0322580636 : f32
    %33 = vector.broadcast %cst_31 : f32 to vector<8x1xf32>
    %34 = arith.mulf %32, %33 : vector<8x1xf32>
    %35 = vector.broadcast %27 : vector<8x1xf32> to vector<8x32xf32>
    %36 = arith.subf %0, %35 : vector<8x32xf32>
    %37 = vector.broadcast %14 : vector<1x32xf32> to vector<8x32xf32>
    %38 = arith.mulf %37, %36 : vector<8x32xf32>
    %39 = math.sqrt %34 : vector<8x1xf32>
    %cst_32 = arith.constant 9.99999997E-7 : f32
    %40 = vector.broadcast %cst_32 : f32 to vector<8x1xf32>
    %41 = arith.addf %39, %40 : vector<8x1xf32>
    %42 = vector.broadcast %41 : vector<8x1xf32> to vector<8x32xf32>
    %43 = arith.divf %38, %42 : vector<8x32xf32>
    %44 = vector.broadcast %15 : vector<1x32xf32> to vector<8x32xf32>
    %45 = arith.addf %43, %44 : vector<8x32xf32>
    %46 = arith.truncf %45 : vector<8x32xf32> to vector<8x32xbf16>
    %cst_33 = arith.constant dense<0.000000e+00> : vector<8x32xf32>
    %47 = tpu.matmul %46, %3, %cst_33 {dimension_numbers = #tpu.dot_dimension_numbers<[1], [0], [0], [1], [0, 0, 1, 1], [], []>} : vector<8x32xbf16>, vector<32x32xbf16>, vector<8x32xf32> -> vector<8x32xf32>
    %48 = vector.broadcast %10 : vector<1x32xf32> to vector<8x32xf32>
    %49 = arith.addf %47, %48 : vector<8x32xf32>
    %cst_34 = arith.constant dense<0.000000e+00> : vector<8x32xf32>
    %50 = tpu.matmul %46, %5, %cst_34 {dimension_numbers = #tpu.dot_dimension_numbers<[1], [0], [0], [1], [0, 0, 1, 1], [], []>} : vector<8x32xbf16>, vector<32x32xbf16>, vector<8x32xf32> -> vector<8x32xf32>
    %51 = vector.broadcast %11 : vector<1x32xf32> to vector<8x32xf32>
    %52 = arith.addf %50, %51 : vector<8x32xf32>
    %cst_35 = arith.constant dense<0.000000e+00> : vector<8x32xf32>
    %53 = tpu.matmul %46, %7, %cst_35 {dimension_numbers = #tpu.dot_dimension_numbers<[1], [0], [0], [1], [0, 0, 1, 1], [], []>} : vector<8x32xbf16>, vector<32x32xbf16>, vector<8x32xf32> -> vector<8x32xf32>
    %54 = vector.broadcast %12 : vector<1x32xf32> to vector<8x32xf32>
    %55 = arith.addf %53, %54 : vector<8x32xf32>
    %56 = vector.shape_cast %49 : vector<8x32xf32> to vector<8x4x8xf32>
    %57 = tpu.transpose %56, [1, 0, 2] : vector<8x4x8xf32> -> vector<4x8x8xf32>
    %58 = arith.truncf %57 : vector<4x8x8xf32> to vector<4x8x8xbf16>
    %59 = vector.shape_cast %52 : vector<8x32xf32> to vector<8x4x8xf32>
    %60 = tpu.transpose %59, [1, 0, 2] : vector<8x4x8xf32> -> vector<4x8x8xf32>
    %61 = arith.truncf %60 : vector<4x8x8xf32> to vector<4x8x8xbf16>
    %62 = vector.shape_cast %55 : vector<8x32xf32> to vector<8x4x8xf32>
    %63 = tpu.transpose %62, [1, 0, 2] : vector<8x4x8xf32> -> vector<4x8x8xf32>
    %64 = arith.truncf %63 : vector<4x8x8xf32> to vector<4x8x8xbf16>
    "tpu.trace_start"() <{level = 10 : i32, message = "hqd,hkd->hqk"}> : () -> ()
    %cst_36 = arith.constant dense<0.000000e+00> : vector<4x8x8xf32>
    %65 = tpu.matmul %58, %61, %cst_36 {dimension_numbers = #tpu.dot_dimension_numbers<[2], [2], [1], [1], [0, 0, 0, 1, 1, 1], [0], [0]>} : vector<4x8x8xbf16>, vector<4x8x8xbf16>, vector<4x8x8xf32> -> vector<4x8x8xf32>
    "tpu.trace_stop"() : () -> ()
    %cst_37 = arith.constant 0.353553385 : f32
    %66 = vector.broadcast %cst_37 : f32 to vector<4x8x8xf32>
    %67 = arith.mulf %65, %66 : vector<4x8x8xf32>
    %68 = vector.broadcast %23 : vector<1x1x8xf32> to vector<4x8x8xf32>
    %69 = arith.addf %67, %68 : vector<4x8x8xf32>
    %cst_38 = arith.constant dense<0xFF800000> : vector<4x8xf32>
    %70 = vector.multi_reduction <maximumf>, %69, %cst_38 [2] : vector<4x8x8xf32> to vector<4x8xf32>
    %71 = vector.shape_cast %70 : vector<4x8xf32> to vector<4x8x1xf32>
    %72 = vector.broadcast %71 : vector<4x8x1xf32> to vector<4x8x8xf32>
    %73 = arith.subf %69, %72 : vector<4x8x8xf32>
    %74 = math.exp %73 : vector<4x8x8xf32>
    %cst_39 = arith.constant dense<0.000000e+00> : vector<4x8xf32>
    %75 = vector.multi_reduction <add>, %74, %cst_39 [2] : vector<4x8x8xf32> to vector<4x8xf32>
    %76 = vector.shape_cast %75 : vector<4x8xf32> to vector<4x8x1xf32>
    %77 = tpu.reciprocal %76 {approx = true} : vector<4x8x1xf32> -> vector<4x8x1xf32>
    %78 = vector.broadcast %77 : vector<4x8x1xf32> to vector<4x8x8xf32>
    %79 = arith.mulf %74, %78 : vector<4x8x8xf32>
    %80 = arith.truncf %79 : vector<4x8x8xf32> to vector<4x8x8xbf16>
    "tpu.trace_start"() <{level = 10 : i32, message = "hqk,hkd->hqd"}> : () -> ()
    %cst_40 = arith.constant dense<0.000000e+00> : vector<4x8x8xf32>
    %81 = tpu.matmul %80, %64, %cst_40 {dimension_numbers = #tpu.dot_dimension_numbers<[2], [1], [1], [2], [0, 0, 0, 1, 1, 2], [0], [0]>} : vector<4x8x8xbf16>, vector<4x8x8xbf16>, vector<4x8x8xf32> -> vector<4x8x8xf32>
    "tpu.trace_stop"() : () -> ()
    %82 = tpu.transpose %81, [1, 0, 2] : vector<4x8x8xf32> -> vector<8x4x8xf32>
    %83 = vector.shape_cast %82 : vector<8x4x8xf32> to vector<8x32xf32>
    %84 = arith.truncf %83 : vector<8x32xf32> to vector<8x32xbf16>
    %cst_41 = arith.constant dense<0.000000e+00> : vector<8x32xf32>
    %85 = tpu.matmul %84, %9, %cst_41 {dimension_numbers = #tpu.dot_dimension_numbers<[1], [0], [0], [1], [0, 0, 1, 1], [], []>} : vector<8x32xbf16>, vector<32x32xbf16>, vector<8x32xf32> -> vector<8x32xf32>
    %86 = vector.broadcast %13 : vector<1x32xf32> to vector<8x32xf32>
    %87 = arith.addf %85, %86 : vector<8x32xf32>
    %88 = arith.addf %0, %87 : vector<8x32xf32>
    %cst_42 = arith.constant dense<0.000000e+00> : vector<8xf32>
    %89 = vector.multi_reduction <add>, %88, %cst_42 [1] : vector<8x32xf32> to vector<8xf32>
    %90 = vector.shape_cast %89 : vector<8xf32> to vector<8x1xf32>
    %cst_43 = arith.constant 3.200000e+01 : f32
    %91 = vector.broadcast %cst_43 : f32 to vector<8x1xf32>
    %92 = arith.divf %90, %91 : vector<8x1xf32>
    %93 = vector.broadcast %92 : vector<8x1xf32> to vector<8x32xf32>
    %94 = arith.subf %88, %93 : vector<8x32xf32>
    %95 = arith.mulf %94, %94 : vector<8x32xf32>
    %cst_44 = arith.constant dense<0.000000e+00> : vector<8xf32>
    %96 = vector.multi_reduction <add>, %95, %cst_44 [1] : vector<8x32xf32> to vector<8xf32>
    %97 = vector.shape_cast %96 : vector<8xf32> to vector<8x1xf32>
    %cst_45 = arith.constant 0.0322580636 : f32
    %98 = vector.broadcast %cst_45 : f32 to vector<8x1xf32>
    %99 = arith.mulf %97, %98 : vector<8x1xf32>
    %100 = vector.broadcast %92 : vector<8x1xf32> to vector<8x32xf32>
    %101 = arith.subf %88, %100 : vector<8x32xf32>
    %102 = vector.broadcast %16 : vector<1x32xf32> to vector<8x32xf32>
    %103 = arith.mulf %102, %101 : vector<8x32xf32>
    %104 = math.sqrt %99 : vector<8x1xf32>
    %cst_46 = arith.constant 9.99999997E-7 : f32
    %105 = vector.broadcast %cst_46 : f32 to vector<8x1xf32>
    %106 = arith.addf %104, %105 : vector<8x1xf32>
    %107 = vector.broadcast %106 : vector<8x1xf32> to vector<8x32xf32>
    %108 = arith.divf %103, %107 : vector<8x32xf32>
    %109 = vector.broadcast %17 : vector<1x32xf32> to vector<8x32xf32>
    %110 = arith.addf %108, %109 : vector<8x32xf32>
    %111 = arith.truncf %110 : vector<8x32xf32> to vector<8x32xbf16>
    %c0_47 = arith.constant 0 : index
    %c0_48 = arith.constant 0 : index
    %112 = vector.load %arg4[%c0_47, %c0_48] : memref<32x64xbf16, #tpu.memory_space<vmem>>, vector<32x64xbf16>
    %cst_49 = arith.constant dense<0.000000e+00> : vector<8x64xf32>
    %113 = tpu.matmul %111, %112, %cst_49 {dimension_numbers = #tpu.dot_dimension_numbers<[1], [0], [0], [1], [0, 0, 1, 1], [], []>} : vector<8x32xbf16>, vector<32x64xbf16>, vector<8x64xf32> -> vector<8x64xf32>
    %c0_50 = arith.constant 0 : index
    %c0_51 = arith.constant 0 : index
    %114 = vector.load %arg6[%c0_50, %c0_51] : memref<1x64xf32, #tpu.memory_space<vmem>>, vector<1x64xf32>
    %115 = vector.broadcast %114 : vector<1x64xf32> to vector<8x64xf32>
    %116 = arith.addf %113, %115 : vector<8x64xf32>
    %cst_52 = arith.constant 0.000000e+00 : f32
    %117 = vector.broadcast %cst_52 : f32 to vector<8x64xf32>
    %118 = arith.maximumf %116, %117 : vector<8x64xf32>
    %119 = arith.truncf %118 : vector<8x64xf32> to vector<8x64xbf16>
    %c0_53 = arith.constant 0 : index
    %c0_54 = arith.constant 0 : index
    %120 = vector.load %arg5[%c0_53, %c0_54] : memref<64x32xbf16, #tpu.memory_space<vmem>>, vector<64x32xbf16>
    %cst_55 = arith.constant dense<0.000000e+00> : vector<8x32xf32>
    %121 = tpu.matmul %119, %120, %cst_55 {dimension_numbers = #tpu.dot_dimension_numbers<[1], [0], [0], [1], [0, 0, 1, 1], [], []>} : vector<8x64xbf16>, vector<64x32xbf16>, vector<8x32xf32> -> vector<8x32xf32>
    %122 = vector.broadcast %18 : vector<1x32xf32> to vector<8x32xf32>
    %123 = arith.addf %121, %122 : vector<8x32xf32>
    %124 = arith.addf %88, %123 : vector<8x32xf32>
    %c0_56 = arith.constant 0 : index
    %c0_57 = arith.constant 0 : index
    %125 = vector.load %arg8[%c0_56, %c0_57] : memref<8x32xf32, #tpu.memory_space<vmem>>, vector<8x32xf32>
    tpu.vector_store %arg8[%c0_56, %c0_57], %124 {strides = array<i32>} : memref<8x32xf32, #tpu.memory_space<vmem>>, vector<8x32xf32>,
    return
  }
  func.func @transform_0(%arg0: i32) -> (i32, i32) {
    %c0_i32 = arith.constant 0 : i32
    %c0_i32_0 = arith.constant 0 : i32
    return %arg0, %c0_i32 : i32, i32
  }
  func.func @transform_1(%arg0: i32) -> (i32, i32, i32) {
    %c0_i32 = arith.constant 0 : i32
    %c0_i32_0 = arith.constant 0 : i32
    %c0_i32_1 = arith.constant 0 : i32
    return %arg0, %c0_i32, %c0_i32_0 : i32, i32, i32
  }
  func.func @transform_2(%arg0: i32) -> (i32, i32, i32) {
    %c0_i32 = arith.constant 0 : i32
    %c0_i32_0 = arith.constant 0 : i32
    %c0_i32_1 = arith.constant 0 : i32
    %c0_i32_2 = arith.constant 0 : i32
    return %c0_i32, %c0_i32_0, %c0_i32_1 : i32, i32, i32
  }
  func.func @transform_3(%arg0: i32) -> (i32, i32) {
    %c0_i32 = arith.constant 0 : i32
    %c0_i32_0 = arith.constant 0 : i32
    %c0_i32_1 = arith.constant 0 : i32
    return %c0_i32, %c0_i32_0 : i32, i32
  }
  func.func @transform_4(%arg0: i32) -> (i32, i32) {
    %c0_i32 = arith.constant 0 : i32
    %c0_i32_0 = arith.constant 0 : i32
    %c0_i32_1 = arith.constant 0 : i32
    return %c0_i32, %c0_i32_0 : i32, i32
  }
  func.func @transform_5(%arg0: i32) -> (i32, i32) {
    %c0_i32 = arith.constant 0 : i32
    %c0_i32_0 = arith.constant 0 : i32
    %c0_i32_1 = arith.constant 0 : i32
    return %c0_i32, %c0_i32_0 : i32, i32
  }
  func.func @transform_6(%arg0: i32) -> (i32, i32) {
    %c0_i32 = arith.constant 0 : i32
    %c0_i32_0 = arith.constant 0 : i32
    %c0_i32_1 = arith.constant 0 : i32
    return %c0_i32, %c0_i32_0 : i32, i32
  }
  func.func @transform_7(%arg0: i32) -> (i32, i32) {
    %c0_i32 = arith.constant 0 : i32
    %c0_i32_0 = arith.constant 0 : i32
    return %arg0, %c0_i32 : i32, i32
  }
}

</mosaic_0001>

<bundles_post_ra>
// kernel: tpu_custom_call.1
= control target key start
LH: loop header
LB: loop body
LE: loop exit
PB: predicated region body
PF: predicated region fallthrough
CT: control target
= control target key end

     0   :  { %12 = vsyncpa [#allocation3], 0  ;;  %s2742_s0 = inlined_call_operand.vmem [shape: f32[16,32], index: 0, kind: input, shape index: {}]   ;;  %s2743_s1 = inlined_call_operand.vmem [shape: f32[2,1,8], index: 1, kind: input, shape index: {}]   ;;  %s2744_s2 = inlined_call_operand.hbm [shape: bf16[4,32,32], index: 2, kind: input, shape index: {}]   ;;  %s2745_s3 = inlined_call_operand.vmem [shape: bf16[32,64], index: 3, kind: input, shape index: {}]   ;;  %s2746_s4 = inlined_call_operand.vmem [shape: bf16[64,32], index: 4, kind: input, shape index: {}]   ;;  %s2747_s5 = inlined_call_operand.vmem [shape: f32[1,64], index: 5, kind: input, shape index: {}]   ;;  %s2748_s6 = inlined_call_operand.vmem [shape: f32[9,32], index: 6, kind: input, shape index: {}]   ;;  %s2749_s7 = inlined_call_operand.hbm [shape: f32[16,32], index: 7, kind: output, shape index: {}]  }
   0x1   :  { %13 = vsyncpa [#allocation4], 0 }
   0x2   :  { %15 = vsyncpa [#allocation4 + $0x1], 0  ;;  %s2355_s24 = smov 0   ;;  %s2357_s25 = smov 0  }
   0x3   :  { %s2359_s26 = smov 0   ;;  %s2361_s27 = smov 0  }
   0x4 LB: > { %s2376_s28 = sadd.s32 4294967295, %s2299_s27   ;;  %s1911_s29 = sadd.s32 4294967294, %s2299_s27   ;;  %s2299_s27 = sphi %s2361_s27, %s2765_s27   ;;  %s2295_s26 = sphi %s2359_s26, %s2764_s26   ;;  %s2291_s25 = sphi %s2357_s25, %s2763_s25   ;;  %s2287_s24 = sphi %s2355_s24, %s2762_s24  }
   0x5   : > { %s2380_s30 = sadd.s32 1, %s2299_s27   ;;  %s185_s8 = sadd.s32 1, %s2295_s26 }
   0x6   : > { %s182_s9 = ssub.s32 %s2299_s27, %s2380_s30  ;;  %p195_p0 = scmp.ne.s32.totalorder %s2295_s26, %s2291_s25 }
   0x7   : > { %p183_p1 = scmp.eq.s32.totalorder %s182_s9, 0  ;;  %p196_p2 = scmp.eq.s32.totalorder %s2376_s28, 1 }
   0x8   : > { %p201_p3 = scmp.ne.s32.totalorder %s2291_s25, %s2287_s24  ;;  %p202_p4 = scmp.eq.s32.totalorder %s1911_s29, 1 }
   0x9   : > { %s2391_s10 = scalar_select %p183_p1, %s2295_s26, %s185_s8  }
   0xa   : > { %p2393_p5 = por %p196_p2, %p195_p0  ;;  %p2397_p6 = por %p202_p4, %p201_p3 }
   0xb   : > { %p1912_p7 = scmp.ge.s32.totalorder %s2299_s27, 1  ;;  %p209_p8 = scmp.lt.s32.totalorder %s2299_s27, 3 }
   0xc   : > { %s2753_s11 = scalar_select %p2393_p5, 1, 0 }
   0xd   : > { %s2754_s12 = scalar_select %p2397_p6, 1, 0 }
   0xe   : > { %p2750_p9 = scmp.eq.s32.totalorder %s2376_s28, 0  ;;  %p2404_p10 = pnand %p1912_p7, %p209_p8 }
   0xf   : > { %s2301_s14 = smov [#allocation2]   ;;  %s2205_s19 = scalar_lea.hbm %s2744_s2, 1024 }
  0x10   : > { %s2755_s13 = scalar_select %p2404_p10, 1, 0 }
  0x11   : > { %s221_s15 = sshll.u32 %s2301_s14, 4  ;;  %p2111_p11 = pneg %p2404_p10  ;;  %s222_s15 = int_to_ptr.vmem [resolvable:$true] %s221_s15 }
  0x12   : > { %p2206_p13 = scmp.ne.s32.totalorder %s2744_s2, %s2205_s19  ;;  %p2212_p3 = scmp.lt.u32.totalorder %s2205_s19, %s2744_s2 }
  0x13   : > { %p2412_p12 = pnand %p2750_p9, %p2111_p11 }
  0x15   : > { %p2207_p0 = pneg %p2412_p12 }
  0x17   : > { %p2208_p1 = pnand %p2207_p0, %p2206_p13 }
  0x19   : > { %p2209_p2 = pneg %p2208_p1 }
  0x1b   : > { %p2214_p4 = pnand %p2212_p3, %p2209_p2 }
  0x1d   : > { %2217 = shalt.err (!%p2214_p4)
}
  0x1e   : > { %s2218_s29 = scalar_lea.vmem %s222_s15, 1024  ;;  %p2226_p9 = scmp.lt.s32.totalorder %s222_s15, %s222_s15 }
  0x1f   : > { %p2219_p7 = scmp.ne.s32.totalorder %s222_s15, %s2218_s29  ;;  %p2227_p6 = scmp.lt.s32.totalorder %s2218_s29, %s2218_s29 }
  0x21   : > { %p2221_p8 = pnand %p2219_p7, %p2207_p0  ;;  %p2228_p5 = por %p2227_p6, %p2226_p9 }
  0x23   : > { %p2222_p11 = pneg %p2221_p8 }
  0x25   : > { %p2229_p10 = pnand %p2228_p5, %p2222_p11 }
  0x27   : > { %2232 = shalt.err (!%p2229_p10)
}
  0x28   : > { %s2302_s8 = smov 64   ;;  %s2303_s9 = smov 4  }
  0x29   : > { %2114 = dma.hbm_to_vmem [thread:$0]  (!%p2412_p12), %s2744_s2, 1024, %s222_s15, [#allocation3], %s2302_s8, %s2302_s8, %s2303_s9  }
  0x2a   : > { %p2757_p13 = scmp.ne.s32.totalorder %s2755_s13, 0 }
  0x2b   : > { %p2758_p1 = scmp.eq.s32.totalorder (!%p2757_p13), %s2376_s28, 0 }
  0x2c   : > { %262 = sbr.rel (%p2757_p13) target bundleno = 2682 (0xa7a), region = 48 }
  0x33   : > { %2278 = dma.done.wait (%p2758_p1), [#allocation3], 1024   ;;  %p2759_p0 = pmov %p2758_p1 }
  0x34   : > { %p296_p5 = scmp.lt.s32.totalorder %s2376_s28, 1  ;;  %v2304_v0 = vmov 0.0   ;;  %vm336_vm0 = vcmask 261120   ;;  %v2167_v8 = vld [vmem:[#allocation2] sm:$0xff]   ;;  %v2168_v9 = vld [vmem:[#allocation2 + $0x10] sm:$0xff]   ;;  %vm2305_vm1 = vmmov 0   ;;  %v555_v47 = vlaneseq }
  0x35   : > { %2280 = vsyncadd (%p2759_p0), [#allocation3], 4294966272  ;;  %2005 = vmatprep.subr.bf16.mxu0 %v2304_v0  ;;  %2013 = vmatprep.subr.bf16.mxu1 %v2304_v0  ;;  %v2169_v10 = vld [vmem:[#allocation2 + $0x8] sm:$0xff]   ;;  %v2170_v11 = vld [vmem:[#allocation2 + $0x18] sm:$0xff]   ;;  %s2306_s9 = smov 104   ;;  %s2307_s14 = smov 120  }
  0x36   : > { %s2442_s16 = scalar_select %p296_p5, %s2376_s28, 1  ;;  %2009 = vmatprep.mubr.msk.bf16.mxu0 %vm2305_vm1, %v2304_v0  ;;  %2017 = vmatprep.mubr.msk.bf16.mxu1 %vm2305_vm1, %v2304_v0  ;;  %v1919_v20 = vld [vmem:[%s2748_s6 + $0x4] ss:$0 sm:$0xff]  ;;  %v1920_v23 = vld [vmem:[%s2748_s6 + $0x5] ss:$0 sm:$0xff]  ;;  %v2172_v28 = vld [vmem:[#allocation2 + $0x28] sm:$0xff]  }
  0x37   : > { %2006 = vmatpush3.bf16.msra.mxu0 %v2167_v8  ;;  %2014 = vmatpush3.bf16.msra.mxu1 %v2168_v9  ;;  %v2171_v26 = vld [vmem:[#allocation2 + $0x20] sm:$0xff]   ;;  %s2308_s13 = smov 112   ;;  %v2309_v45 = vmov 1983009808   ;;  %v2310_v48 = vmov 1934713408  }
  0x38   : > { %s1918_s15 = sshll.u32 %s2442_s16, 3  ;;  %2007 = vmatprep.subr.bf16.mxu0 %v2304_v0  ;;  %2015 = vmatprep.subr.bf16.mxu1 %v2304_v0  ;;  %v1925_v29 = vld [vmem:[%s2748_s6 + $0x1] ss:$0 sm:$0xff]  ;;  %v1921_v39 = vld [vmem:[%s2748_s6] ss:$0 sm:$0xff]  ;;  %v553_v46 = vunpack.c.l.s4 %v2309_v45  ;;  %v585_v49 = vunpack.c.l.s4 %v2310_v48  ;;  %v2493_v51 = vshrl.u32 %v555_v47, 7  ;;  %s302_s20 = scalar_lea.vmem %s2743_s1, %s2442_s16 }
  0x39   : > { %s299_s19 = scalar_lea.vmem %s2742_s0, %s1918_s15  ;;  %vm990_vm4 = vcmask 64512   ;;  %vm1240_vm6 = vcmask 1043456   ;;  %s2311_s22 = smov 16   ;;  %vm1571_vm7 = vcmask 130048   ;;  %vm1573_vm8 = vcmask 195584  }
  0x3a   : > { %v2448_v1 = vld [vmem:[%s299_s19] sm:$0xff]  ;;  %v554_v50 = vunpack.c.0.s8 %v553_v46  ;;  %v586_v54 = vunpack.c.0.s8 %v585_v49  ;;  %s2312_s23 = smov 8   ;;  %s2313_s29 = smov 24   ;;  %vm1771_vm11 = vcmask 523264  }
  0x3b   : > { %v337_v2 = vsel %vm336_vm0, %v2448_v1, 0.0  ;;  %2008 = vmatpush3.bf16.msra.mxu0 %v2169_v10  ;;  %2016 = vmatpush3.bf16.msra.mxu1 %v2170_v11  ;;  %s293_s18 = sand.u32 1, %s2291_s25   ;;  %s1966_s21 = sshll.u32 %s2376_s28, 7 }
  0x3c   : > { %338 = vadd.xlane.f32.xlu0 %v337_v2  ;;  %2021 = vmatprep.subr.bf16.mxu0 %v2304_v0  ;;  %v2496_v55 = vsub.s32 %v554_v50, %v2493_v51  ;;  %v2499_v61 = vsub.s32 %v586_v54, %v2493_v51  ;;  %s1917_s19 = sshll.u32 %s293_s18, 3  ;;  %s1818_s28 = scalar_lea.sflag [#allocation4], %s293_s18 }
  0x3d   : > { %2029 = vmatprep.subr.bf16.mxu1 %v2304_v0  ;;  %p2760_p9 = scmp.ne.s32.totalorder %s2753_s11, 0  ;;  %s2314_s17 = smov [#allocation5]  }
  0x3e   : > { %s2237_s15 = sshll.u32 %s2314_s17, 4  ;;  %s2238_s15 = int_to_ptr.vmem [resolvable:$false] %s2237_s15 }
  0xc9   : > { %v339_v3 = vpop.xlane.xlu0 %338 }
  0xca   : > { %v341_v4 = vmul.f32 0.03125, %v339_v3 }
  0xcc   : > { %v342_v5 = vsub.f32 %v2448_v1, %v341_v4 }
  0xce   : > { %v343_v6 = vmul.f32 %v342_v5, %v342_v5  ;;  %v352_v21 = vmul.f32 %v1919_v20, %v342_v5 }
  0xd0   : > { %v344_v7 = vsel %vm336_vm0, %v343_v6, 0.0 }
  0xd1   : > { %345 = vadd.xlane.f32.xlu0 %v344_v7 }
 0x15e   : > { %v346_v12 = vpop.xlane.xlu0 %345 }
 0x15f   : > { %v347_v13 = vmul.f32 0.032258064, %v346_v12 }
 0x161   : > { %2181 = vrsqrt.f32 %v347_v13  ;;  %vm355_vm2 = vcmp.eq.f32.partialorder %v347_v13, inf  ;;  %v358_v16 = vand.u32 2147483648, %v347_v13  ;;  %vm357_vm3 = vcmp.eq.f32.partialorder %v347_v13, 0.0 }
 0x16b   : > { %v2182_v14 = vpop.eup %2181 }
 0x16c   : > { %v354_v15 = vmul.f32 %v2182_v14, %v347_v13 }
 0x16e   : > { %v356_v17 = vsel %vm355_vm2, %v347_v13, %v354_v15 }
 0x16f   : > { %v359_v18 = vsel %vm357_vm3, %v358_v16, %v356_v17 }
 0x170   : > { %v360_v19 = vadd.f32 1e-06, %v359_v18 }
 0x172   : > { %2183 = vrcp.f32 %v360_v19 }
 0x17c   : > { %v2184_v22 = vpop.eup %2183 }
 0x17d   : > { %v362_v24 = vmul.f32 %v2184_v22, %v352_v21 }
 0x17f   : > { %v367_v25 = vadd.f32 %v1920_v23, %v362_v24 }
 0x181   : > { %v368_v27 = vpack.c.bf16 %v367_v25, %v367_v25 }
 0x183   : > { %2010 = vmatmul.mubr.msk.bf16.vlgmr.msra.gmra.mrb[0].mxu0 %vm336_vm0, %v368_v27  ;;  %2018 = vmatmul.mubr.msk.bf16.vlgmr.msra.gmra.mrb[0].mxu1 %vm336_vm0, %v368_v27 }
 0x184   : > { %2022 = vmatpush3.bf16.msra.mxu0 %v2171_v26  ;;  %2025 = vmatprep.mubr.msk.bf16.mxu0 %vm2305_vm1, %v2304_v0 }
 0x185   : > { %2023 = vmatprep.subr.bf16.mxu0 %v2304_v0  ;;  %2031 = vmatprep.mubr.msk.bf16.mxu1 %vm2305_vm1, %v2304_v0 }
 0x188   : > { %2024 = vmatpush3.bf16.msra.mxu0 %v2172_v28 }
 0x189   : > { %2035 = vmatprep.subr.bf16.mxu0 %v2304_v0 }
 0x18b   : > { %2026 = vmatmul.mubr.msk.bf16.vlgmr.msra.gmra.mrb[4].mxu0 %vm336_vm0, %v368_v27 }
 0x18c   : > { %2037 = vmatprep.mubr.msk.bf16.mxu0 %vm2305_vm1, %v2304_v0 }
 0x256   : > { %v422_v30 = vpop.f32.mrb[0].mxu0  ;;  %v478_v31 = vpop.f32.mrb[0].mxu1 }
 0x257   : > { %v479_v32 = vadd.f32 %v1925_v29, %v478_v31  ;;  %v2011_v33 = vpop.f32.mrb[1].mxu0  ;;  %v2019_v34 = vpop.f32.mrb[1].mxu1  ;;  %v423_v41 = vadd.f32 %v1921_v39, %v422_v30 }
 0x258   : > { %v425_v35 = vpop.f32.mrb[2].mxu0  ;;  %v481_v36 = vpop.f32.mrb[2].mxu1 }
 0x259   : > { %697 = vrot.lane.b32.xlu0 %v479_v32, %s2306_s9  ;;  %691 = vrot.lane.b32.xlu1 %v479_v32, %s2307_s14  ;;  %v2012_v37 = vpop.f32.mrb[3].mxu0  ;;  %v2020_v38 = vpop.f32.mrb[3].mxu1 }
 0x25d   : > { %694 = vrot.lane.b32.xlu1 %v479_v32, %s2308_s13 }
 0x25e   : > { %v2488_v40 = vpop.f32.mrb[4].mxu0 }
 0x25f   : > { %v2027_v42 = vpop.f32.mrb[5].mxu0 }
 0x260   : > { %v537_v43 = vpop.f32.mrb[6].mxu0 }
 0x261   : > { %541 = vrot.lane.b32.xlu1 %v423_v41, %s2307_s14  ;;  %v2028_v44 = vpop.f32.mrb[7].mxu0 }
 0x265   : > { %544 = vrot.lane.b32.xlu1 %v423_v41, %s2308_s13 }
 0x269   : > { %547 = vrot.lane.b32.xlu1 %v423_v41, %s2306_s9 }
 0x2cb   : > { %v698_v52 = vpop.permute.xlu0 %697  ;;  %v692_v53 = vpop.permute.xlu1 %691 }
 0x2cc   : > { %v716_v56 = vcombine.low %v692_v53, %v698_v52  ;;  %v717_v57 = vcombine.high %v692_v53, %v698_v52 }
 0x2ce   : > { %v724_v62 = vrot.slane %v716_v56, %v2496_v55  ;;  %v731_v63 = vrot.slane %v717_v57, %v2496_v55 }
 0x2cf   : > { %v695_v58 = vpop.permute.xlu1 %694 }
 0x2d0   : > { %v700_v59 = vcombine.low %v479_v32, %v695_v58  ;;  %v701_v60 = vcombine.high %v479_v32, %v695_v58 }
 0x2d2   : > { %v708_v2 = vrot.slane %v700_v59, %v2496_v55  ;;  %v715_v3 = vrot.slane %v701_v60, %v2496_v55 }
 0x2d3   : > { %v542_v4 = vpop.permute.xlu1 %541 }
 0x2d4   : > { %v732_v5 = vcombine.low %v708_v2, %v724_v62  ;;  %v733_v6 = vcombine.high %v708_v2, %v724_v62  ;;  %v748_v7 = vcombine.low %v715_v3, %v731_v63  ;;  %v749_v8 = vcombine.high %v715_v3, %v731_v63 }
 0x2d6   : > { %v740_v9 = vrot.slane %v732_v5, %v2499_v61  ;;  %v747_v10 = vrot.slane %v733_v6, %v2499_v61  ;;  %v756_v11 = vrot.slane %v748_v7, %v2499_v61  ;;  %v763_v12 = vrot.slane %v749_v8, %v2499_v61 }
 0x2d7   : > { %v545_v13 = vpop.permute.xlu1 %544 }
 0x2d8   : > { %v768_v14 = vcombine.low %v740_v9, %v747_v10  ;;  %v1935_v15 = vcombine.high %v740_v9, %v747_v10  ;;  %v784_v16 = vcombine.low %v756_v11, %v763_v12  ;;  %v1936_v17 = vcombine.high %v756_v11, %v763_v12 }
 0x2d9   : > { %v550_v18 = vcombine.low %v423_v41, %v545_v13  ;;  %v551_v19 = vcombine.high %v423_v41, %v545_v13 }
 0x2da   : > { %v775_v20 = vrot.slane %v768_v14, %v2496_v55  ;;  %v783_v21 = vrot.slane %v1935_v15, %v2496_v55  ;;  %v791_v22 = vrot.slane %v784_v16, %v2496_v55  ;;  %v799_v23 = vrot.slane %v1936_v17, %v2496_v55 }
 0x2db   : > { %v548_v24 = vpop.permute.xlu1 %547  ;;  %v558_v29 = vrot.slane %v550_v18, %v2496_v55  ;;  %v565_v30 = vrot.slane %v551_v19, %v2496_v55 }
 0x2dc   : > { %v566_v25 = vcombine.low %v542_v4, %v548_v24  ;;  %v567_v26 = vcombine.high %v542_v4, %v548_v24  ;;  %v800_v27 = vcombine.low %v775_v20, %v783_v21  ;;  %v816_v28 = vcombine.low %v791_v22, %v799_v23 }
 0x2dd   : > { %v801_v35 = vcombine.high %v775_v20, %v783_v21  ;;  %v817_v36 = vcombine.high %v791_v22, %v799_v23 }
 0x2de   : > { %v574_v31 = vrot.slane %v566_v25, %v2496_v55  ;;  %v581_v32 = vrot.slane %v567_v26, %v2496_v55  ;;  %v808_v33 = vrot.slane %v800_v27, %v2499_v61  ;;  %v824_v34 = vrot.slane %v816_v28, %v2499_v61  ;;  %v305_v25 = vld [vmem:[%s302_s20] sm:$0x1] }
 0x2df   : > { %v815_v50 = vrot.slane %v801_v35, %v2499_v61  ;;  %v831_v52 = vrot.slane %v817_v36, %v2499_v61  ;;  %vm334_vm5 = vcmp.eq.f32.partialorder %v305_v25, 0.0  ;;  %v1182_v26 = vsub.s32 0, %v2493_v51 }
 0x2e0   : > { %v582_v37 = vcombine.low %v558_v29, %v574_v31  ;;  %v583_v38 = vcombine.high %v558_v29, %v574_v31  ;;  %v598_v39 = vcombine.low %v565_v30, %v581_v32  ;;  %v599_v41 = vcombine.high %v565_v30, %v581_v32 }
 0x2e1   : > { %v832_v42 = vcombine.low %v808_v33, %v824_v34  ;;  %v833_v43 = vcombine.high %v808_v33, %v824_v34  ;;  %v834_v5 = vcombine.low %v815_v50, %v831_v52  ;;  %v835_v6 = vcombine.high %v815_v50, %v831_v52 }
 0x2e2   : > { %v590_v44 = vrot.slane %v582_v37, %v2499_v61  ;;  %v597_v45 = vrot.slane %v583_v38, %v2499_v61  ;;  %v606_v46 = vrot.slane %v598_v39, %v2499_v61  ;;  %v613_v47 = vrot.slane %v599_v41, %v2499_v61 }
 0x2e3   : > { %v836_v48 = vpack.c.bf16 %v832_v42, %v832_v42  ;;  %v837_v49 = vpack.c.bf16 %v833_v43, %v833_v43  ;;  %v838_v13 = vpack.c.bf16 %v834_v5, %v834_v5  ;;  %v839_v14 = vpack.c.bf16 %v835_v6, %v835_v6 }
 0x2e4   : > { %v618_v53 = vcombine.low %v590_v44, %v597_v45  ;;  %v1933_v54 = vcombine.high %v590_v44, %v597_v45  ;;  %v634_v56 = vcombine.low %v606_v46, %v613_v47  ;;  %v1934_v57 = vcombine.high %v606_v46, %v613_v47 }
 0x2e5   : > { %v995_v58 = vsel %vm990_vm4, %v836_v48, 0  ;;  %v1041_v59 = vsel %vm990_vm4, %v837_v49, 0  ;;  %v1087_v19 = vsel %vm990_vm4, %v838_v13, 0  ;;  %v1133_v20 = vsel %vm990_vm4, %v839_v14, 0 }
 0x2e6   : > { %v625_v60 = vrot.slane %v618_v53, %v2496_v55  ;;  %v633_v62 = vrot.slane %v1933_v54, %v2496_v55  ;;  %v641_v63 = vrot.slane %v634_v56, %v2496_v55  ;;  %v649_v2 = vrot.slane %v1934_v57, %v2496_v55  ;;  %2030 = vmatpush3.bf16.xpose.msra.mxu1 %v995_v58 }
 0x2e7   : > { %2036 = vmatpush3.bf16.xpose.msra.mxu0 %v1041_v59  ;;  %2041 = vmatprep.subr.bf16.mxu1 %v2304_v0  ;;  %v335_v27 = vsel %vm334_vm5, -1e+09, %v2304_v0  ;;  %v1929_v59 = vld [vmem:[%s2748_s6 + $0x2] ss:$0 sm:$0xff] }
 0x2e8   : > { %v650_v3 = vcombine.low %v625_v60, %v633_v62  ;;  %v666_v4 = vcombine.low %v641_v63, %v649_v2  ;;  %2047 = vmatprep.subr.bf16.mxu0 %v2304_v0  ;;  %v651_v7 = vcombine.high %v625_v60, %v633_v62  ;;  %v667_v8 = vcombine.high %v641_v63, %v649_v2 }
 0x2e9   : > { %v1183_v28 = vrot.slane %v335_v27, %v1182_v26  ;;  %v535_v60 = vadd.f32 %v1929_v59, %v2488_v40 }
 0x2ea   : > { %v658_v9 = vrot.slane %v650_v3, %v2499_v61  ;;  %v674_v10 = vrot.slane %v666_v4, %v2499_v61  ;;  %v665_v17 = vrot.slane %v651_v7, %v2499_v61  ;;  %v681_v18 = vrot.slane %v667_v8, %v2499_v61 }
 0x2ec   : > { %v682_v11 = vcombine.low %v658_v9, %v674_v10  ;;  %v683_v12 = vcombine.high %v658_v9, %v674_v10  ;;  %v684_v21 = vcombine.low %v665_v17, %v681_v18  ;;  %v685_v22 = vcombine.high %v665_v17, %v681_v18 }
 0x2ee   : > { %v686_v15 = vpack.c.bf16 %v682_v11, %v682_v11  ;;  %v687_v16 = vpack.c.bf16 %v683_v12, %v683_v12  ;;  %v688_v23 = vpack.c.bf16 %v684_v21, %v684_v21  ;;  %v689_v24 = vpack.c.bf16 %v685_v22, %v685_v22 }
 0x2f0   : > { %2032 = vmatmul.mubr.msk.bf16.vlgmr.msra.gmra.mrb[4].mxu1 %vm990_vm4, %v686_v15  ;;  %2038 = vmatmul.mubr.msk.bf16.vlgmr.msra.gmra.mrb[8].mxu0 %vm990_vm4, %v687_v16 }
 0x2f1   : > { %2042 = vmatpush3.bf16.xpose.msra.mxu1 %v1087_v19  ;;  %2048 = vmatpush3.bf16.xpose.msra.mxu0 %v1133_v20 }
 0x2f2   : > { %2043 = vmatprep.mubr.msk.bf16.mxu1 %vm2305_vm1, %v2304_v0  ;;  %2049 = vmatprep.mubr.msk.bf16.mxu0 %vm2305_vm1, %v2304_v0 }
 0x2f3   : > { %2053 = vmatprep.subr.bf16.mxu1 %v2304_v0  ;;  %2059 = vmatprep.subr.bf16.mxu0 %v2304_v0 }
 0x2f8   : > { %2044 = vmatmul.mubr.msk.bf16.vlgmr.msra.gmra.mrb[8].mxu1 %vm990_vm4, %v688_v23  ;;  %2050 = vmatmul.mubr.msk.bf16.vlgmr.msra.gmra.mrb[12].mxu0 %vm990_vm4, %v689_v24 }
 0x2f9   : > { %2055 = vmatprep.mubr.msk.bf16.mxu1 %vm2305_vm1, %v2304_v0  ;;  %2061 = vmatprep.mubr.msk.bf16.mxu0 %vm2305_vm1, %v2304_v0 }
 0x3c3   : > { %v1031_v29 = vpop.f32.mrb[4].mxu1  ;;  %v1077_v30 = vpop.f32.mrb[8].mxu0 }
 0x3c4   : > { %v1175_v31 = vmul.f32 0.35355338, %v1031_v29  ;;  %v1176_v32 = vmul.f32 0.35355338, %v1077_v30  ;;  %v2033_v33 = vpop.f32.mrb[5].mxu1  ;;  %v2039_v34 = vpop.f32.mrb[9].mxu0 }
 0x3c5   : > { %v1034_v35 = vpop.f32.mrb[6].mxu1  ;;  %v1080_v36 = vpop.f32.mrb[10].mxu0 }
 0x3c6   : > { %v2034_v37 = vpop.f32.mrb[7].mxu1  ;;  %v2040_v38 = vpop.f32.mrb[11].mxu0  ;;  %v1185_v39 = vadd.f32 %v1183_v28, %v1175_v31  ;;  %v1186_v41 = vadd.f32 %v1183_v28, %v1176_v32 }
 0x3c8   : > { %v1189_v42 = vsel %vm990_vm4, %v1185_v39, -inf  ;;  %v1192_v43 = vsel %vm990_vm4, %v1186_v41, -inf }
 0x3c9   : > { %1190 = vmax.xlane.f32.xlu1 %v1189_v42  ;;  %1193 = vmax.xlane.f32.xlu0 %v1192_v43 }
 0x3cb   : > { %v1123_v51 = vpop.f32.mrb[8].mxu1  ;;  %v1169_v44 = vpop.f32.mrb[12].mxu0 }
 0x3cc   : > { %v1177_v45 = vmul.f32 0.35355338, %v1123_v51  ;;  %v1178_v46 = vmul.f32 0.35355338, %v1169_v44  ;;  %v2045_v47 = vpop.f32.mrb[9].mxu1  ;;  %v2051_v48 = vpop.f32.mrb[13].mxu0 }
 0x3cd   : > { %v1126_v49 = vpop.f32.mrb[10].mxu1  ;;  %v1172_v50 = vpop.f32.mrb[14].mxu0 }
 0x3ce   : > { %v2046_v52 = vpop.f32.mrb[11].mxu1  ;;  %v2052_v53 = vpop.f32.mrb[15].mxu0  ;;  %v1187_v54 = vadd.f32 %v1183_v28, %v1177_v45  ;;  %v1188_v56 = vadd.f32 %v1183_v28, %v1178_v46 }
 0x3d0   : > { %v1195_v57 = vsel %vm990_vm4, %v1187_v54, -inf  ;;  %v1198_v58 = vsel %vm990_vm4, %v1188_v56, -inf }
 0x3d1   : > { %1196 = vmax.xlane.f32.xlu1 %v1195_v57 }
 0x3d5   : > { %1199 = vmax.xlane.f32.xlu1 %v1198_v58 }
 0x3e6   : > { %844 = vrot.lane.b32.xlu1 %v535_v60, %s2308_s13  ;;  %s2239_s13 = scalar_lea.vmem %s2238_s15, 256 }
 0x456   : > { %v1191_v62 = vpop.xlane.xlu1 %1190  ;;  %v1194_v63 = vpop.xlane.xlu0 %1193 }
 0x457   : > { %v1201_v2 = vsub.f32 %v1185_v39, %v1191_v62  ;;  %v1202_v3 = vsub.f32 %v1186_v41, %v1194_v63 }
 0x459   : > { %v1205_v4 = vmul.f32 1.442695, %v1201_v2  ;;  %v1207_v5 = vmul.f32 1.442695, %v1202_v3 }
 0x45b   : > { %2185 = vpow2.f32 %v1205_v4 }
 0x45c   : > { %2187 = vpow2.f32 %v1207_v5 }
 0x45e   : > { %v1197_v9 = vpop.xlane.xlu1 %1196 }
 0x45f   : > { %v1203_v11 = vsub.f32 %v1187_v54, %v1197_v9 }
 0x461   : > { %v1209_v13 = vmul.f32 1.442695, %v1203_v11 }
 0x462   : > { %v1200_v10 = vpop.xlane.xlu1 %1199 }
 0x463   : > { %v1204_v12 = vsub.f32 %v1188_v56, %v1200_v10  ;;  %2189 = vpow2.f32 %v1209_v13 }
 0x465   : > { %v2568_v6 = vpop.eup %2185  ;;  %v1211_v14 = vmul.f32 1.442695, %v1204_v12 }
 0x466   : > { %v2570_v7 = vpop.eup %2187  ;;  %v1213_v8 = vsel %vm990_vm4, %v2568_v6, 0.0  ;;  %v845_v19 = vpop.permute.xlu1 %844 }
 0x467   : > { %1214 = vadd.xlane.f32.xlu0 %v1213_v8  ;;  %v1216_v40 = vsel %vm990_vm4, %v2570_v7, 0.0  ;;  %2191 = vpow2.f32 %v1211_v14  ;;  %v850_v22 = vcombine.low %v535_v60, %v845_v19  ;;  %v851_v23 = vcombine.high %v535_v60, %v845_v19 }
 0x468   : > { %1217 = vadd.xlane.f32.xlu1 %v1216_v40 }
 0x469   : > { %v858_v28 = vrot.slane %v850_v22, %v2496_v55  ;;  %v865_v29 = vrot.slane %v851_v23, %v2496_v55 }
 0x46d   : > { %v2578_v15 = vpop.eup %2189 }
 0x46e   : > { %v1219_v17 = vsel %vm990_vm4, %v2578_v15, 0.0 }
 0x471   : > { %v2580_v16 = vpop.eup %2191 }
 0x472   : > { %v1222_v18 = vsel %vm990_vm4, %v2580_v16, 0.0 }
 0x479   : > { %847 = vrot.lane.b32.xlu1 %v535_v60, %s2306_s9  ;;  %s2699_s9 = scalar_lea.hbm %s2749_s7, %s1966_s21 }
 0x47d   : > { %841 = vrot.lane.b32.xlu0 %v535_v60, %s2307_s14 }
 0x49c   : > { %1220 = vadd.xlane.f32.xlu0 %v1219_v17 }
 0x49d   : > { %1223 = vadd.xlane.f32.xlu1 %v1222_v18 }
 0x4f4   : > { %v1215_v20 = vpop.xlane.xlu0 %1214 }
 0x4f5   : > { %v1218_v21 = vpop.xlane.xlu1 %1217  ;;  %2193 = vrcp.f32 %v1215_v20 }
 0x4f6   : > { %2195 = vrcp.f32 %v1218_v21 }
 0x4f8   : > { %v842_v24 = vpop.permute.xlu0 %841 }
 0x4f9   : > { %v848_v25 = vpop.permute.xlu1 %847 }
 0x4fa   : > { %v866_v26 = vcombine.low %v842_v24, %v848_v25  ;;  %v867_v27 = vcombine.high %v842_v24, %v848_v25  ;;  %v2173_v24 = vld [vmem:[#allocation2 + $0x30] sm:$0xff]  }
 0x4fc   : > { %v874_v30 = vrot.slane %v866_v26, %v2496_v55  ;;  %v881_v31 = vrot.slane %v867_v27, %v2496_v55 }
 0x4fe   : > { %v882_v32 = vcombine.low %v858_v28, %v874_v30  ;;  %v883_v33 = vcombine.high %v858_v28, %v874_v30  ;;  %v898_v34 = vcombine.low %v865_v29, %v881_v31  ;;  %v899_v35 = vcombine.high %v865_v29, %v881_v31 }
 0x4ff   : > { %v2194_v56 = vpop.eup %2193 }
 0x500   : > { %v890_v36 = vrot.slane %v882_v32, %v2499_v61  ;;  %v897_v37 = vrot.slane %v883_v33, %v2499_v61  ;;  %v906_v38 = vrot.slane %v898_v34, %v2499_v61  ;;  %v913_v39 = vrot.slane %v899_v35, %v2499_v61  ;;  %v2196_v59 = vpop.eup %2195 }
 0x501   : > { %v1229_v3 = vmul.f32 %v2194_v56, %v2568_v6  ;;  %v1230_v4 = vmul.f32 %v2196_v59, %v2570_v7 }
 0x502   : > { %v918_v41 = vcombine.low %v890_v36, %v897_v37  ;;  %v1937_v42 = vcombine.high %v890_v36, %v897_v37  ;;  %v934_v43 = vcombine.low %v906_v38, %v913_v39  ;;  %v1938_v51 = vcombine.high %v906_v38, %v913_v39 }
 0x503   : > { %v1233_v12 = vpack.c.bf16 %v1229_v3, %v1229_v3  ;;  %v1234_v13 = vpack.c.bf16 %v1230_v4, %v1230_v4 }
 0x504   : > { %v925_v44 = vrot.slane %v918_v41, %v2496_v55  ;;  %v933_v45 = vrot.slane %v1937_v42, %v2496_v55  ;;  %v941_v46 = vrot.slane %v934_v43, %v2496_v55  ;;  %v949_v47 = vrot.slane %v1938_v51, %v2496_v55 }
 0x506   : > { %v950_v48 = vcombine.low %v925_v44, %v933_v45  ;;  %v951_v49 = vcombine.high %v925_v44, %v933_v45  ;;  %v966_v50 = vcombine.low %v941_v46, %v949_v47  ;;  %v967_v52 = vcombine.high %v941_v46, %v949_v47 }
 0x508   : > { %v958_v53 = vrot.slane %v950_v48, %v2499_v61  ;;  %v965_v54 = vrot.slane %v951_v49, %v2499_v61  ;;  %v974_v57 = vrot.slane %v966_v50, %v2499_v61  ;;  %v981_v58 = vrot.slane %v967_v52, %v2499_v61  ;;  %v2174_v52 = vld [vmem:[#allocation2 + $0x38] sm:$0xff]  }
 0x50a   : > { %v982_v60 = vcombine.low %v958_v53, %v974_v57  ;;  %v983_v62 = vcombine.high %v958_v53, %v974_v57  ;;  %v984_v63 = vcombine.low %v965_v54, %v981_v58  ;;  %v985_v2 = vcombine.high %v965_v54, %v981_v58 }
 0x50c   : > { %v986_v5 = vpack.c.bf16 %v982_v60, %v982_v60  ;;  %v987_v8 = vpack.c.bf16 %v983_v62, %v983_v62  ;;  %v988_v10 = vpack.c.bf16 %v984_v63, %v984_v63  ;;  %v989_v11 = vpack.c.bf16 %v985_v2, %v985_v2 }
 0x50e   : > { %v1242_v40 = vsel %vm1240_vm6, %v986_v5, 0  ;;  %v1288_v9 = vsel %vm1240_vm6, %v987_v8, 0  ;;  %v1334_v6 = vsel %vm1240_vm6, %v988_v10, 0  ;;  %v1380_v7 = vsel %vm1240_vm6, %v989_v11, 0 }
 0x50f   : > { %2054 = vmatpush3.bf16.msra.mxu1 %v1242_v40  ;;  %2060 = vmatpush3.bf16.msra.mxu0 %v1288_v9 }
 0x510   : > { %2065 = vmatprep.subr.bf16.mxu1 %v2304_v0  ;;  %2071 = vmatprep.subr.bf16.mxu0 %v2304_v0 }
 0x512   : > { %2056 = vmatmul.mubr.msk.bf16.vlgmr.msra.gmra.mrb[12].mxu1 %vm990_vm4, %v1233_v12  ;;  %2062 = vmatmul.mubr.msk.bf16.vlgmr.msra.gmra.mrb[16].mxu0 %vm990_vm4, %v1234_v13 }
 0x513   : > { %2066 = vmatpush3.bf16.msra.mxu1 %v1334_v6  ;;  %2072 = vmatpush3.bf16.msra.mxu0 %v1380_v7 }
 0x514   : > { %2067 = vmatprep.mubr.msk.bf16.mxu1 %vm2305_vm1, %v2304_v0  ;;  %2073 = vmatprep.mubr.msk.bf16.mxu0 %vm2305_vm1, %v2304_v0 }
 0x515   : > { %2077 = vmatprep.subr.bf16.mxu1 %v2304_v0  ;;  %2085 = vmatprep.subr.bf16.mxu0 %v2304_v0 }
 0x529   : > { %v1221_v14 = vpop.xlane.xlu0 %1220 }
 0x52a   : > { %2197 = vrcp.f32 %v1221_v14  ;;  %v1224_v17 = vpop.xlane.xlu1 %1223 }
 0x52b   : > { %2199 = vrcp.f32 %v1224_v17 }
 0x534   : > { %v2198_v18 = vpop.eup %2197 }
 0x535   : > { %v2200_v19 = vpop.eup %2199  ;;  %v1231_v20 = vmul.f32 %v2198_v18, %v2578_v15 }
 0x536   : > { %v1232_v21 = vmul.f32 %v2200_v19, %v2580_v16 }
 0x537   : > { %v1235_v22 = vpack.c.bf16 %v1231_v20, %v1231_v20 }
 0x538   : > { %v1236_v23 = vpack.c.bf16 %v1232_v21, %v1232_v21 }
 0x539   : > { %2068 = vmatmul.mubr.msk.bf16.vlgmr.msra.gmra.mrb[16].mxu1 %vm990_vm4, %v1235_v22 }
 0x53a   : > { %2074 = vmatmul.mubr.msk.bf16.vlgmr.msra.gmra.mrb[20].mxu0 %vm990_vm4, %v1236_v23  ;;  %2081 = vmatprep.mubr.msk.bf16.mxu1 %vm2305_vm1, %v2304_v0  ;;  %v1949_v23 = vld [vmem:[%s2748_s6 + $0x3] ss:$0 sm:$0xff] }
 0x53b   : > { %2089 = vmatprep.mubr.msk.bf16.mxu0 %vm2305_vm1, %v2304_v0  ;;  %2078 = vmatpush3.bf16.msra.mxu1 %v2173_v24 }
 0x53c   : > { %2079 = vmatprep.subr.bf16.mxu1 %v2304_v0 }
 0x53f   : > { %2080 = vmatpush3.bf16.msra.mxu1 %v2174_v52 }
 0x540   : > { %2093 = vmatprep.subr.bf16.mxu1 %v2304_v0 }
 0x5e5   : > { %v1278_v25 = vpop.f32.mrb[12].mxu1  ;;  %v1324_v15 = vpop.f32.mrb[16].mxu0 }
 0x5e6   : > { %v2057_v26 = vpop.f32.mrb[13].mxu1  ;;  %v2063_v16 = vpop.f32.mrb[17].mxu0 }
 0x5e7   : > { %v1281_v27 = vpop.f32.mrb[14].mxu1  ;;  %v1327_v28 = vpop.f32.mrb[18].mxu0 }
 0x5e8   : > { %v2058_v29 = vpop.f32.mrb[15].mxu1  ;;  %v2064_v30 = vpop.f32.mrb[19].mxu0 }
 0x60c   : > { %v1370_v31 = vpop.f32.mrb[16].mxu1 }
 0x60d   : > { %v1422_v32 = vcombine.low %v1278_v25, %v1370_v31  ;;  %v1423_v33 = vcombine.high %v1278_v25, %v1370_v31  ;;  %v1416_v34 = vpop.f32.mrb[20].mxu0  ;;  %v2069_v35 = vpop.f32.mrb[17].mxu1 }
 0x60e   : > { %v1438_v36 = vcombine.low %v1324_v15, %v1416_v34  ;;  %v1439_v37 = vcombine.high %v1324_v15, %v1416_v34  ;;  %v2075_v38 = vpop.f32.mrb[21].mxu0  ;;  %v1373_v39 = vpop.f32.mrb[18].mxu1  ;;  %v2175_v34 = vld [vmem:[%s2745_s3] sm:$0xff]  }
 0x60f   : > { %v1430_v41 = vrot.slane %v1422_v32, %v2496_v55  ;;  %v1437_v42 = vrot.slane %v1423_v33, %v2496_v55  ;;  %v1419_v43 = vpop.f32.mrb[22].mxu0  ;;  %v2070_v51 = vpop.f32.mrb[19].mxu1  ;;  %2086 = vmatpush3.bf16.msra.mxu0 %v2175_v34  ;;  %v2177_v35 = vld [vmem:[%s2746_s4] sm:$0xff]  }
 0x610   : > { %v1446_v44 = vrot.slane %v1438_v36, %v2496_v55  ;;  %v1453_v45 = vrot.slane %v1439_v37, %v2496_v55  ;;  %v2076_v46 = vpop.f32.mrb[23].mxu0  ;;  %2087 = vmatprep.subr.bf16.mxu0 %v2304_v0  ;;  %v2178_v36 = vld [vmem:[%s2746_s4 + $0x8] sm:$0xff]  }
 0x612   : > { %v1454_v47 = vcombine.low %v1430_v41, %v1446_v44  ;;  %v1455_v48 = vcombine.high %v1430_v41, %v1446_v44  ;;  %v1470_v49 = vcombine.low %v1437_v42, %v1453_v45  ;;  %v1471_v50 = vcombine.high %v1437_v42, %v1453_v45  ;;  %v1953_v45 = vld [vmem:[%s2748_s6 + $0x6] ss:$0 sm:$0xff] }
 0x614   : > { %v1462_v53 = vrot.slane %v1454_v47, %v2499_v61  ;;  %v1469_v54 = vrot.slane %v1455_v48, %v2499_v61  ;;  %v1478_v56 = vrot.slane %v1470_v49, %v2499_v61  ;;  %v1485_v57 = vrot.slane %v1471_v50, %v2499_v61  ;;  %v1954_v48 = vld [vmem:[%s2748_s6 + $0x7] ss:$0 sm:$0xff] }
 0x616   : > { %v1490_v58 = vcombine.low %v1462_v53, %v1469_v54  ;;  %v1947_v59 = vcombine.high %v1462_v53, %v1469_v54  ;;  %v1506_v60 = vcombine.low %v1478_v56, %v1485_v57  ;;  %v1948_v62 = vcombine.high %v1478_v56, %v1485_v57  ;;  %v2179_v53 = vld [vmem:[%s2746_s4 + $0x10] sm:$0xff]   ;;  %v2180_v54 = vld [vmem:[%s2746_s4 + $0x18] sm:$0xff]   ;;  %v1955_v56 = vld [vmem:[%s2747_s5] ss:$0 sm:$0xff] }
 0x618   : > { %v1497_v63 = vrot.slane %v1490_v58, %v2496_v55  ;;  %v1505_v2 = vrot.slane %v1947_v59, %v2496_v55  ;;  %v1513_v3 = vrot.slane %v1506_v60, %v2496_v55  ;;  %v1521_v4 = vrot.slane %v1948_v62, %v2496_v55 }
 0x61a   : > { %v1523_v5 = vcombine.high %v1497_v63, %v1505_v2  ;;  %v1539_v8 = vcombine.high %v1513_v3, %v1521_v4  ;;  %v1522_v40 = vcombine.low %v1497_v63, %v1505_v2  ;;  %v1538_v9 = vcombine.low %v1513_v3, %v1521_v4 }
 0x61c   : > { %v1537_v10 = vrot.slane %v1523_v5, %v2499_v61  ;;  %v1553_v11 = vrot.slane %v1539_v8, %v2499_v61  ;;  %v1530_v12 = vrot.slane %v1522_v40, %v2499_v61  ;;  %v1546_v13 = vrot.slane %v1538_v9, %v2499_v61 }
 0x61e   : > { %v1556_v6 = vcombine.low %v1537_v10, %v1553_v11  ;;  %v1555_v7 = vcombine.high %v1530_v12, %v1546_v13  ;;  %v1557_v14 = vcombine.high %v1537_v10, %v1553_v11  ;;  %v1554_v17 = vcombine.low %v1530_v12, %v1546_v13 }
 0x620   : > { %1563 = vrot.lane.b32.xlu1 %v1556_v6, %s2311_s22  ;;  %1559 = vrot.lane.b32.xlu0 %v1555_v7, %s2312_s23  ;;  %s295_s22 = scalar_lea.vmem [#allocation5], %s1917_s19 }
 0x621   : > { %s1831_s23 = sshll.u32 %s295_s22, 4  ;;  %s2701_s23 = int_to_ptr.vmem [resolvable:$true] %s1831_s23 }
 0x622   : > { %s2233_s14 = scalar_lea.vmem %s2701_s23, 128  ;;  %p2240_p2 = scmp.lt.s32.totalorder %s2701_s23, %s2238_s15 }
 0x623   : > { %p2234_p6 = scmp.ne.s32.totalorder %s2701_s23, %s2233_s14  ;;  %p2241_p3 = scmp.lt.s32.totalorder %s2239_s13, %s2233_s14 }
 0x624   : > { %1567 = vrot.lane.b32.xlu0 %v1557_v14, %s2313_s29 }
 0x625   : > { %p2235_p10 = pnand %p2234_p6, %p2760_p9  ;;  %p2242_p4 = por %p2241_p3, %p2240_p2 }
 0x627   : > { %p2236_p12 = pneg %p2235_p10 }
 0x629   : > { %p2243_p7 = pnand %p2242_p4, %p2236_p12 }
 0x692   : > { %v1560_v55 = vpop.permute.xlu0 %1559  ;;  %v1564_v18 = vpop.permute.xlu1 %1563 }
 0x693   : > { %v1570_v19 = vsel %vm990_vm4, %v1554_v17, %v1560_v55 }
 0x694   : > { %v1572_v21 = vsel %vm1571_vm7, %v1570_v19, %v1564_v18 }
 0x696   : > { %v1568_v20 = vpop.permute.xlu0 %1567 }
 0x697   : > { %v1574_v22 = vsel %vm1573_vm8, %v1572_v21, %v1568_v20 }
 0x698   : > { %v1575_v61 = vpack.c.bf16 %v1574_v22, %v1574_v22 }
 0x69a   : > { %2082 = vmatmul.mubr.msk.bf16.vlgmr.msra.gmra.mrb[20].mxu1 %vm336_vm0, %v1575_v61 }
 0x69b   : > { %2101 = vmatprep.mubr.msk.bf16.mxu1 %vm2305_vm1, %v2304_v0  ;;  %2094 = vmatpush3.bf16.msra.mxu1 %v2177_v35 }
 0x69c   : > { %2095 = vmatprep.subr.bf16.mxu1 %v2304_v0 }
 0x69f   : > { %2096 = vmatpush3.bf16.msra.mxu1 %v2178_v36 }
 0x6a0   : > { %2097 = vmatprep.subr.bf16.mxu1 %v2304_v0 }
 0x6a3   : > { %2098 = vmatpush3.bf16.msra.mxu1 %v2179_v53 }
 0x6a4   : > { %2099 = vmatprep.subr.bf16.mxu1 %v2304_v0  ;;  %v1959_v0 = vld [vmem:[%s2748_s6 + $0x8] ss:$0 sm:$0xff] }
 0x6a7   : > { %2100 = vmatpush3.bf16.msra.mxu1 %v2180_v54 }
 0x76d   : > { %v1629_v24 = vpop.f32.mrb[20].mxu1 }
 0x76e   : > { %v1630_v25 = vadd.f32 %v1949_v23, %v1629_v24  ;;  %v2083_v15 = vpop.f32.mrb[21].mxu1 }
 0x76f   : > { %v1632_v26 = vpop.f32.mrb[22].mxu1 }
 0x770   : > { %v2652_v16 = vadd.f32 %v1630_v25, %v2448_v1  ;;  %v2084_v27 = vpop.f32.mrb[23].mxu1  ;;  %v2176_v1 = vld [vmem:[%s2745_s3 + $0x8] sm:$0xff]  }
 0x771   : > { %2088 = vmatpush3.bf16.msra.mxu0 %v2176_v1 }
 0x772   : > { %v1636_v28 = vsel %vm336_vm0, %v2652_v16, 0.0 }
 0x773   : > { %1637 = vadd.xlane.f32.xlu1 %v1636_v28 }
 0x800   : > { %v1638_v29 = vpop.xlane.xlu1 %1637 }
 0x801   : > { %v1639_v30 = vmul.f32 0.03125, %v1638_v29 }
 0x803   : > { %v1640_v31 = vsub.f32 %v2652_v16, %v1639_v30 }
 0x805   : > { %v1641_v32 = vmul.f32 %v1640_v31, %v1640_v31  ;;  %v1650_v46 = vmul.f32 %v1953_v45, %v1640_v31 }
 0x807   : > { %v1642_v33 = vsel %vm336_vm0, %v1641_v32, 0.0 }
 0x808   : > { %1643 = vadd.xlane.f32.xlu0 %v1642_v33 }
 0x895   : > { %v1644_v37 = vpop.xlane.xlu0 %1643 }
 0x896   : > { %v1645_v38 = vmul.f32 0.032258064, %v1644_v37 }
 0x898   : > { %2201 = vrsqrt.f32 %v1645_v38  ;;  %vm1653_vm9 = vcmp.eq.f32.partialorder %v1645_v38, inf  ;;  %v1656_v42 = vand.u32 2147483648, %v1645_v38  ;;  %vm1655_vm10 = vcmp.eq.f32.partialorder %v1645_v38, 0.0 }
 0x8a2   : > { %v2202_v39 = vpop.eup %2201 }
 0x8a3   : > { %v1652_v41 = vmul.f32 %v2202_v39, %v1645_v38 }
 0x8a5   : > { %v1654_v43 = vsel %vm1653_vm9, %v1645_v38, %v1652_v41 }
 0x8a6   : > { %v1657_v51 = vsel %vm1655_vm10, %v1656_v42, %v1654_v43 }
 0x8a7   : > { %v1658_v44 = vadd.f32 1e-06, %v1657_v51 }
 0x8a9   : > { %2203 = vrcp.f32 %v1658_v44 }
 0x8b3   : > { %v2204_v47 = vpop.eup %2203 }
 0x8b4   : > { %v1660_v49 = vmul.f32 %v2204_v47, %v1650_v46 }
 0x8b6   : > { %v1665_v50 = vadd.f32 %v1954_v48, %v1660_v49 }
 0x8b8   : > { %v1666_v52 = vpack.c.bf16 %v1665_v50, %v1665_v50 }
 0x8ba   : > { %2090 = vmatmul.mubr.msk.bf16.vlgmr.msra.gmra.mrb[24].mxu0 %vm336_vm0, %v1666_v52 }
 0x98d   : > { %v1727_v57 = vpop.f32.mrb[24].mxu0 }
 0x98e   : > { %v1728_v58 = vadd.f32 %v1955_v56, %v1727_v57  ;;  %v2091_v59 = vpop.f32.mrb[25].mxu0 }
 0x98f   : > { %v1730_v60 = vpop.f32.mrb[26].mxu0 }
 0x990   : > { %v1733_v62 = vmax.f32 %v1728_v58, 0.0  ;;  %v2092_v63 = vpop.f32.mrb[27].mxu0 }
 0x992   : > { %v1734_v2 = vpack.c.bf16 %v1733_v62, %v1733_v62 }
 0x994   : > { %2102 = vmatmul.mubr.msk.bf16.vlgmr.msra.gmra.mrb[24].mxu1 %vm1771_vm11, %v1734_v2 }
 0xa67   : > { %v1809_v3 = vpop.f32.mrb[24].mxu1 }
 0xa68   : > { %v1810_v4 = vadd.f32 %v1959_v0, %v1809_v3  ;;  %v2103_v5 = vpop.f32.mrb[25].mxu1 }
 0xa69   : > { %v1812_v8 = vpop.f32.mrb[26].mxu1 }
 0xa6a   : > { %v1815_v40 = vadd.f32 %v1810_v4, %v2652_v16  ;;  %v2104_v9 = vpop.f32.mrb[27].mxu1 }
 0xa6c   : > { %1816 = vst.msk [vmem:[%s295_s22] sm:$0xff] %vm336_vm0, %v1815_v40 }
 0xa6d   : > { %2246 = shalt.err (!%p2243_p7)
}
 0xa6e   : > { %s2247_s18 = scalar_lea.hbm %s2699_s9, 128  ;;  %s2251_s16 = scalar_lea.hbm %s2749_s7, 256 }
 0xa6f   : > { %p2248_p8 = scmp.ne.s32.totalorder %s2699_s9, %s2247_s18  ;;  %p2252_p1 = scmp.lt.u32.totalorder %s2699_s9, %s2749_s7 }
 0xa70   : > { %p2253_p0 = scmp.lt.u32.totalorder %s2251_s16, %s2247_s18  ;;  %p2255_p6 = scmp.lt.u32.totalorder %s2247_s18, %s2699_s9 }
 0xa71   : > { %p2249_p11 = pnand %p2248_p8, %p2760_p9 }
 0xa72   : > { %p2254_p5 = por %p2253_p0, %p2252_p1 }
 0xa73   : > { %p2250_p13 = pneg %p2249_p11 }
 0xa74   : > { %p2256_p10 = por %p2255_p6, %p2254_p5 }
 0xa76   : > { %p2257_p12 = pnand %p2256_p10, %p2250_p13 }
 0xa78   : > { %2260 = shalt.err (!%p2257_p12)
}
 0xa79   : > { %2109 = dma.vmem_to_hbm [thread:$0]  (%p2760_p9), %s2701_s23, 128, %s2699_s9, %s1818_s28  }
 0xa7a PF: > { %p2121_p2 = scmp.ge.s32.totalorder %s2299_s27, 2  ;;  %s1843_s29 = sand.u32 1, %s2287_s24  }
 0xa7b   : > { %p2761_p3 = scmp.ne.s32.totalorder %s2754_s12, 0  ;;  %s1844_s8 = scalar_lea.sflag [#allocation4], %s1843_s29 }
 0xa7d   : > { %p2116_p4 = pnand %p2121_p2, %p2761_p3 }
 0xa7f   : > { %2282 = dma.done.wait (!%p2116_p4), %s1844_s8, 128  }
 0xa80   : > { %2284 = vsyncadd (!%p2116_p4), %s1844_s8, 4294967168  ;;  %p18_p7 = scmp.ge.s32.totalorder %s2380_s30, 4   ;;  %s2762_s24 = smov %s2291_s25 }
 0xa81   : > { %s2763_s25 = smov %s2295_s26  ;;  %s2764_s26 = smov %s2391_s10 }
 0xa82   : > { %s2765_s27 = smov %s2380_s30  ;;  %20 = sbr.rel (!%p18_p7) target bundleno = 4 (0x4), region = 94 }
 0xa89   :  { %1849 = vsyncpa [#allocation3], 1 }
 0xa8a   :  { %1851 = vsyncpa [#allocation3 + $0x1], 1 }
 0xa8b   :  { %1852 = vsyncpa [#allocation4], 1 }
 0xa8c   :  { %1854 = vsyncpa [#allocation4 + $0x1], 1 }

</bundles_post_ra>
